<compile_context>
chip_gen: v7x
topology: tpu7x:2x2x1
jax: 0.10.0
libtpu: 0.0.40
codegen_flags: <defaults>
</compile_context>

<pallas_src>
import functools

import jax
import jax.numpy as jnp
from jax.experimental import pallas as pl
from jax.experimental.pallas import tpu as pltpu

BN_EPS = 1e-5
_LANE = 128
_SUBLANE = 8
_MAX_TB = 2048


def _round_up(v, m):
    return (v + m - 1) // m * m


def _vmem_budgets():
    """Per-generation scoped-VMEM limit and working-set budget."""
    try:
        phys = int(pltpu.get_tpu_info().vmem_capacity_bytes)
    except Exception:
        phys = 64 * 1024 * 1024            # conservative (v7x-sized) fallback
    limit = min(int(phys * 0.75), 112 * 1024 * 1024)    # ~96 MiB v5e/v6e, ~48 MiB v7x
    budget = min(int(phys * 0.625), 96 * 1024 * 1024)   # ~80 MiB v5e/v6e, ~40 MiB v7x
    return limit, budget


def _largest_divisor_leq(n, cap):
    cap = max(1, min(cap, n))
    best = 1
    for d in range(1, cap + 1):
        if n % d == 0:
            best = d
    return best


def _pass1_tile_cap(ip, hp, mm_bytes, budget):
    """Largest Pass-1 batch tile whose working set fits the budget.
    Resident (single-buffered): w1 (matmul dtype) + gamma/beta + sum/sq scratch
    + scale/shift.  Streamed (double-buffered): x tile (f32) + h tile (matmul dtype)."""
    f32 = 4
    resident = ip * hp * mm_bytes + 6 * hp * f32
    tb = _MAX_TB
    while tb > _SUBLANE:
        streamed = 2 * tb * (ip * f32 + hp * mm_bytes)
        if resident + streamed <= budget:
            break
        tb //= 2
    return tb


def _pass2_tile_cap(hp, op, mm_bytes, budget):
    """Pass-2 working set: resident w2 + scale/shift/b2; streamed h tile + out tile."""
    f32 = 4
    resident = hp * op * mm_bytes + (2 * hp + op) * f32
    tb = _MAX_TB
    while tb > _SUBLANE:
        streamed = 2 * tb * (hp * mm_bytes + op * f32)
        if resident + streamed <= budget:
            break
        tb //= 2
    return tb


def _resident_spec(block_shape):
    """Constant-index BlockSpec -> single-buffered resident VMEM copy."""
    return pl.BlockSpec(block_shape, lambda *_: (0,) * len(block_shape),
                        pipeline_mode=pl.Buffered(1))


# ---------------------------------------------------------------------------
# Pass 1: fc1 + BN statistics accumulation -> folded scale/shift
# ---------------------------------------------------------------------------
def _fc1_stats_kernel(x_ref, w1_ref, g_ref, beta_ref,          # inputs
                      h_ref, scale_ref, shift_ref,             # outputs
                      sum_ref, sq_ref,                         # VMEM scratch
                      *, inv_batch, matmul_dtype):
    i = pl.program_id(0)

    @pl.when(i == 0)
    def _():
        sum_ref[...] = jnp.zeros_like(sum_ref)
        sq_ref[...] = jnp.zeros_like(sq_ref)

    # fc1 (bias dropped: a per-feature constant cancels under batch-stat BN).
    # Only the streamed x tile is cast in-kernel; w1 was pre-cast in the wrapper.
    h = jnp.dot(x_ref[...].astype(matmul_dtype), w1_ref[...],
                preferred_element_type=jnp.float32)
    h_ref[...] = h.astype(h_ref.dtype)

    # Per-feature running sums in f32 (padded batch rows are zero -> contribute 0).
    sum_ref[...] += jnp.sum(h, axis=0, keepdims=True)
    sq_ref[...] += jnp.sum(h * h, axis=0, keepdims=True)

    @pl.when(i == pl.num_programs(0) - 1)
    def _():
        mean = sum_ref[...] * inv_batch
        var = jnp.maximum(sq_ref[...] * inv_batch - mean * mean, 0.0)
        scale = g_ref[...] * jax.lax.rsqrt(var + BN_EPS)
        scale_ref[...] = scale
        shift_ref[...] = beta_ref[...] - mean * scale


# ---------------------------------------------------------------------------
# Pass 2: folded BN (scale/shift) + ReLU + fc2
# ---------------------------------------------------------------------------
def _bn_relu_fc2_kernel(h_ref, scale_ref, shift_ref, w2_ref, b2_ref, o_ref,
                        *, matmul_dtype):
    # BN apply + ReLU on the VPU in f32 (v5e has no bf16 VALU), then MXU fc2.
    h = h_ref[...].astype(jnp.float32)
    h = jnp.maximum(h * scale_ref[...] + shift_ref[...], 0.0)
    out = jnp.dot(h.astype(matmul_dtype), w2_ref[...],
                  preferred_element_type=jnp.float32) + b2_ref[...]
    o_ref[...] = out.astype(o_ref.dtype)


def projector_forward(x, w1, gamma, beta, w2, b2, *, matmul_dtype=jnp.bfloat16):
    """x: (B, I) f32; w1: (I, H); gamma/beta: (1, H); w2: (H, O); b2: (1, O)."""
    B, I = x.shape
    H = w1.shape[1]
    O = w2.shape[1]
    mm_bytes = jnp.dtype(matmul_dtype).itemsize

    vmem_limit, vmem_budget = _vmem_budgets()

    # Lane-dense padding of feature dims.
    Ip, Hp, Op = (_round_up(d, _LANE) for d in (I, H, O))

    # Pass-1 batch tile: largest cap that fits, then shrunk so it tiles the
    # batch evenly (no MXU/HBM work on all-zero pad rows).
    tb1_cap = _pass1_tile_cap(Ip, Hp, mm_bytes, vmem_budget)
    nb1 = -(-B // tb1_cap)
    TB1 = _round_up(-(-B // nb1), _SUBLANE)
    nb1 = -(-B // TB1)
    Bp = nb1 * TB1

    # Pass-2 tile: usually larger (no w1, no x stream); kept a multiple of TB1
    # so it divides Bp exactly.
    tb2_cap = _pass2_tile_cap(Hp, Op, mm_bytes, vmem_budget)
    TB2 = TB1 * _largest_divisor_leq(nb1, max(1, tb2_cap // TB1))
    nb2 = Bp // TB2

    xp = jnp.pad(x, ((0, Bp - B), (0, Ip - I)))
    # Resident weights pre-cast once in the wrapper: halves their VMEM footprint
    # and removes the per-grid-step in-kernel cast.
    w1p = jnp.pad(w1, ((0, Ip - I), (0, Hp - H))).astype(matmul_dtype)
    w2p = jnp.pad(w2, ((0, Hp - H), (0, Op - O))).astype(matmul_dtype)
    gp = jnp.pad(gamma, ((0, 0), (0, Hp - H)))   # padded gamma = 0 -> padded cols stay 0
    bp = jnp.pad(beta, ((0, 0), (0, Hp - H)))
    b2p = jnp.pad(b2, ((0, 0), (0, Op - O)))

    # ---- Pass 1: fc1 + BN stats (batch axis is a reduction -> "arbitrary") ----
    h, scale, shift = pl.pallas_call(
        functools.partial(_fc1_stats_kernel,
                          inv_batch=1.0 / float(B),
                          matmul_dtype=matmul_dtype),
        out_shape=(jax.ShapeDtypeStruct((Bp, Hp), matmul_dtype),   # h stored narrow
                   jax.ShapeDtypeStruct((1, Hp), jnp.float32),
                   jax.ShapeDtypeStruct((1, Hp), jnp.float32)),
        grid_spec=pltpu.PrefetchScalarGridSpec(
            num_scalar_prefetch=0,
            grid=(nb1,),
            in_specs=[
                pl.BlockSpec((TB1, Ip), lambda i: (i, 0)),   # x tile (streamed)
                _resident_spec((Ip, Hp)),                    # w1 (resident, single-buffered)
                _resident_spec((1, Hp)),                     # gamma
                _resident_spec((1, Hp)),                     # beta
            ],
            out_specs=[
                pl.BlockSpec((TB1, Hp), lambda i: (i, 0)),   # h tile (matmul dtype)
                pl.BlockSpec((1, Hp), lambda i: (0, 0)),     # folded scale
                pl.BlockSpec((1, Hp), lambda i: (0, 0)),     # folded shift
            ],
            scratch_shapes=[pltpu.VMEM((1, Hp), jnp.float32),   # sum
                            pltpu.VMEM((1, Hp), jnp.float32)],  # sum of squares
        ),
        compiler_params=pltpu.CompilerParams(
            dimension_semantics=("arbitrary",),
            vmem_limit_bytes=vmem_limit),
    )(xp, w1p, gp, bp)

    # ---- Pass 2: BN apply + ReLU + fc2 (batch axis fully parallel) ----
    out = pl.pallas_call(
        functools.partial(_bn_relu_fc2_kernel, matmul_dtype=matmul_dtype),
        out_shape=jax.ShapeDtypeStruct((Bp, Op), jnp.float32),
        grid_spec=pltpu.PrefetchScalarGridSpec(
            num_scalar_prefetch=0,
            grid=(nb2,),
            in_specs=[
                pl.BlockSpec((TB2, Hp), lambda i: (i, 0)),   # h tile (streamed, narrow)
                _resident_spec((1, Hp)),                     # scale
                _resident_spec((1, Hp)),                     # shift
                _resident_spec((Hp, Op)),                    # w2 (resident, single-buffered)
                _resident_spec((1, Op)),                     # b2
            ],
            out_specs=pl.BlockSpec((TB2, Op), lambda i: (i, 0)),
        ),
        compiler_params=pltpu.CompilerParams(
            dimension_semantics=("parallel",),
            vmem_limit_bytes=vmem_limit),
    )(h, scale, shift, w2p, b2p)

    return out[:B, :O]


# ---------------------------------------------------------------------------
# Parameter init (matches the PyTorch module) and a pure-JAX reference
# ---------------------------------------------------------------------------
def xavier_uniform(key, fan_in, fan_out):
    bound = (6.0 / (fan_in + fan_out)) ** 0.5
    # PyTorch weight is (out, in); we store the transpose (in, out).
    return jax.random.uniform(key, (fan_in, fan_out), jnp.float32, -bound, bound)


def init_params(key, input_size, intermediate_size, output_size):
    k1, k2, k3, k4 = jax.random.split(key, 4)
    w1 = xavier_uniform(k1, input_size, intermediate_size)
    w2 = xavier_uniform(k2, intermediate_size, output_size)
    bb1 = 1.0 / (input_size ** 0.5)
    bb2 = 1.0 / (intermediate_size ** 0.5)
    # b1 is kept only for the reference: training-mode BN cancels it exactly,
    # so the kernel never loads or adds it.
    b1 = jax.random.uniform(k3, (1, intermediate_size), jnp.float32, -bb1, bb1)
    b2 = jax.random.uniform(k4, (1, output_size), jnp.float32, -bb2, bb2)
    gamma = jnp.ones((1, intermediate_size), jnp.float32)   # BN weight
    beta = jnp.zeros((1, intermediate_size), jnp.float32)   # BN bias
    return w1, b1, gamma, beta, w2, b2


def reference_forward(x, w1, b1, gamma, beta, w2, b2):
    h = x @ w1 + b1
    mean = jnp.mean(h, axis=0, keepdims=True)
    var = jnp.mean((h - mean) ** 2, axis=0, keepdims=True)
    h = (h - mean) / jnp.sqrt(var + BN_EPS) * gamma + beta
    h = jnp.maximum(h, 0.0)
    return h @ w2 + b2


if __name__ == "__main__":
    key = jax.random.PRNGKey(0)
    kx, kp = jax.random.split(key)

    B, INPUT, INTER, OUTPUT = 8, 32, 64, 16
    x = jax.random.normal(kx, (B, INPUT), jnp.float32)
    w1, b1, gamma, beta, w2, b2 = init_params(kp, INPUT, INTER, OUTPUT)

    ref = reference_forward(x, w1, b1, gamma, beta, w2, b2)

    # f32 MXU path: close to the f32 reference (tolerance allows for TPU
    # default matmul precision on both sides).
    out_f32 = jax.block_until_ready(
        projector_forward(x, w1, gamma, beta, w2, b2, matmul_dtype=jnp.float32))
    assert out_f32.shape == (B, OUTPUT)
    err_f32 = float(jnp.max(jnp.abs(out_f32 - ref)))
    assert jnp.allclose(out_f32, ref, atol=2e-2, rtol=2e-2), err_f32

    # Default bf16 MXU path (f32 accumulate): looser tolerance for bf16 operands.
    out_bf16 = jax.block_until_ready(projector_forward(x, w1, gamma, beta, w2, b2))
    assert out_bf16.shape == (B, OUTPUT)
    err_bf16 = float(jnp.max(jnp.abs(out_bf16 - ref)))
    assert jnp.allclose(out_bf16, ref, atol=2.5e-1, rtol=5e-2), err_bf16

    print("KERNEL_OK")
</pallas_src>

<mosaic_0001>
module attributes {stable_mosaic.version = 11 : i64} {
  func.func @_fc1_stats_kernel(%arg0: i32, %arg1: memref<8x128xf32, #tpu.memory_space<vmem>>, %arg2: memref<128x128xf32, #tpu.memory_space<vmem>>, %arg3: memref<1x128xf32, #tpu.memory_space<vmem>>, %arg4: memref<1x128xf32, #tpu.memory_space<vmem>>, %arg5: memref<8x128xf32, #tpu.memory_space<vmem>>, %arg6: memref<1x128xf32, #tpu.memory_space<vmem>>, %arg7: memref<1x128xf32, #tpu.memory_space<vmem>>, %arg8: memref<1x128xf32, #tpu.memory_space<vmem>>, %arg9: memref<1x128xf32, #tpu.memory_space<vmem>>) attributes {dimension_semantics = [#tpu.dimension_semantics<arbitrary>], iteration_bounds = array<i64: 1>, scalar_prefetch = 0 : i64, scratch_operands = 2 : i64, tpu.core_type = #tpu.core_type<tc>, window_params = [{transform_indices = @transform_0, window_bounds = array<i64: 8, 128>}, {pipeline_mode = #tpu.pipeline_mode<synchronous>, transform_indices = @transform_1, window_bounds = array<i64: 128, 128>}, {pipeline_mode = #tpu.pipeline_mode<synchronous>, transform_indices = @transform_2, window_bounds = array<i64: 1, 128>}, {pipeline_mode = #tpu.pipeline_mode<synchronous>, transform_indices = @transform_3, window_bounds = array<i64: 1, 128>}, {transform_indices = @transform_4, window_bounds = array<i64: 8, 128>}, {pipeline_mode = #tpu.pipeline_mode<synchronous>, transform_indices = @transform_5, window_bounds = array<i64: 1, 128>}, {pipeline_mode = #tpu.pipeline_mode<synchronous>, transform_indices = @transform_6, window_bounds = array<i64: 1, 128>}]} {
    %c0_i32 = arith.constant 0 : i32
    %0 = arith.cmpi eq, %arg0, %c0_i32 : i32
    %1 = arith.extui %0 : i1 to i32
    %c0_i32_0 = arith.constant 0 : i32
    %2 = arith.cmpi ne, %1, %c0_i32_0 : i32
    scf.if %2 {
      %cst_18 = arith.constant 0.000000e+00 : f32
      %21 = vector.broadcast %cst_18 : f32 to vector<1x128xf32>
      %c0_19 = arith.constant 0 : index
      %c0_20 = arith.constant 0 : index
      %22 = vector.load %arg8[%c0_19, %c0_20] : memref<1x128xf32, #tpu.memory_space<vmem>>, vector<1x128xf32>
      tpu.vector_store %arg8[%c0_19, %c0_20], %21 {strides = array<i32>} : memref<1x128xf32, #tpu.memory_space<vmem>>, vector<1x128xf32>,
      %cst_21 = arith.constant 0.000000e+00 : f32
      %23 = vector.broadcast %cst_21 : f32 to vector<1x128xf32>
      %c0_22 = arith.constant 0 : index
      %c0_23 = arith.constant 0 : index
      %24 = vector.load %arg9[%c0_22, %c0_23] : memref<1x128xf32, #tpu.memory_space<vmem>>, vector<1x128xf32>
      tpu.vector_store %arg9[%c0_22, %c0_23], %23 {strides = array<i32>} : memref<1x128xf32, #tpu.memory_space<vmem>>, vector<1x128xf32>,
    } else {
    }
    %c0 = arith.constant 0 : index
    %c0_1 = arith.constant 0 : index
    %3 = vector.load %arg1[%c0, %c0_1] : memref<8x128xf32, #tpu.memory_space<vmem>>, vector<8x128xf32>
    %c0_2 = arith.constant 0 : index
    %c0_3 = arith.constant 0 : index
    %4 = vector.load %arg2[%c0_2, %c0_3] : memref<128x128xf32, #tpu.memory_space<vmem>>, vector<128x128xf32>
    %cst = arith.constant dense<0.000000e+00> : vector<8x128xf32>
    %5 = tpu.matmul %3, %4, %cst {dimension_numbers = #tpu.dot_dimension_numbers<[1], [0], [0], [1], [0, 0, 1, 1], [], []>} : vector<8x128xf32>, vector<128x128xf32>, vector<8x128xf32> -> vector<8x128xf32>
    %c0_4 = arith.constant 0 : index
    %c0_5 = arith.constant 0 : index
    %6 = vector.load %arg5[%c0_4, %c0_5] : memref<8x128xf32, #tpu.memory_space<vmem>>, vector<8x128xf32>
    tpu.vector_store %arg5[%c0_4, %c0_5], %5 {strides = array<i32>} : memref<8x128xf32, #tpu.memory_space<vmem>>, vector<8x128xf32>,
    %c0_6 = arith.constant 0 : index
    %c0_7 = arith.constant 0 : index
    %7 = vector.load %arg8[%c0_6, %c0_7] : memref<1x128xf32, #tpu.memory_space<vmem>>, vector<1x128xf32>
    %cst_8 = arith.constant dense<0.000000e+00> : vector<128xf32>
    %8 = vector.multi_reduction <add>, %5, %cst_8 [0] : vector<8x128xf32> to vector<128xf32>
    %9 = vector.shape_cast %8 : vector<128xf32> to vector<1x128xf32>
    %10 = arith.addf %7, %9 : vector<1x128xf32>
    %c0_9 = arith.constant 0 : index
    %c0_10 = arith.constant 0 : index
    %11 = vector.load %arg8[%c0_9, %c0_10] : memref<1x128xf32, #tpu.memory_space<vmem>>, vector<1x128xf32>
    tpu.vector_store %arg8[%c0_9, %c0_10], %10 {strides = array<i32>} : memref<1x128xf32, #tpu.memory_space<vmem>>, vector<1x128xf32>,
    %c0_11 = arith.constant 0 : index
    %c0_12 = arith.constant 0 : index
    %12 = vector.load %arg9[%c0_11, %c0_12] : memref<1x128xf32, #tpu.memory_space<vmem>>, vector<1x128xf32>
    %13 = arith.mulf %5, %5 : vector<8x128xf32>
    %cst_13 = arith.constant dense<0.000000e+00> : vector<128xf32>
    %14 = vector.multi_reduction <add>, %13, %cst_13 [0] : vector<8x128xf32> to vector<128xf32>
    %15 = vector.shape_cast %14 : vector<128xf32> to vector<1x128xf32>
    %16 = arith.addf %12, %15 : vector<1x128xf32>
    %c0_14 = arith.constant 0 : index
    %c0_15 = arith.constant 0 : index
    %17 = vector.load %arg9[%c0_14, %c0_15] : memref<1x128xf32, #tpu.memory_space<vmem>>, vector<1x128xf32>
    tpu.vector_store %arg9[%c0_14, %c0_15], %16 {strides = array<i32>} : memref<1x128xf32, #tpu.memory_space<vmem>>, vector<1x128xf32>,
    %c0_i32_16 = arith.constant 0 : i32
    %18 = arith.cmpi eq, %arg0, %c0_i32_16 : i32
    %19 = arith.extui %18 : i1 to i32
    %c0_i32_17 = arith.constant 0 : i32
    %20 = arith.cmpi ne, %19, %c0_i32_17 : i32
    scf.if %20 {
      %c0_18 = arith.constant 0 : index
      %c0_19 = arith.constant 0 : index
      %21 = vector.load %arg8[%c0_18, %c0_19] : memref<1x128xf32, #tpu.memory_space<vmem>>, vector<1x128xf32>
      %cst_20 = arith.constant 1.250000e-01 : f32
      %22 = vector.broadcast %cst_20 : f32 to vector<1x128xf32>
      %23 = arith.mulf %21, %22 : vector<1x128xf32>
      %c0_21 = arith.constant 0 : index
      %c0_22 = arith.constant 0 : index
      %24 = vector.load %arg9[%c0_21, %c0_22] : memref<1x128xf32, #tpu.memory_space<vmem>>, vector<1x128xf32>
      %cst_23 = arith.constant 1.250000e-01 : f32
      %25 = vector.broadcast %cst_23 : f32 to vector<1x128xf32>
      %26 = arith.mulf %24, %25 : vector<1x128xf32>
      %27 = arith.mulf %23, %23 : vector<1x128xf32>
      %28 = arith.subf %26, %27 : vector<1x128xf32>
      %cst_24 = arith.constant 0.000000e+00 : f32
      %29 = vector.broadcast %cst_24 : f32 to vector<1x128xf32>
      %30 = arith.maximumf %28, %29 : vector<1x128xf32>
      %c0_25 = arith.constant 0 : index
      %c0_26 = arith.constant 0 : index
      %31 = vector.load %arg3[%c0_25, %c0_26] : memref<1x128xf32, #tpu.memory_space<vmem>>, vector<1x128xf32>
      %cst_27 = arith.constant 9.99999974E-6 : f32
      %32 = vector.broadcast %cst_27 : f32 to vector<1x128xf32>
      %33 = arith.addf %30, %32 : vector<1x128xf32>
      %34 = math.rsqrt %33 : vector<1x128xf32>
      %35 = arith.mulf %31, %34 : vector<1x128xf32>
      %c0_28 = arith.constant 0 : index
      %c0_29 = arith.constant 0 : index
      %36 = vector.load %arg6[%c0_28, %c0_29] : memref<1x128xf32, #tpu.memory_space<vmem>>, vector<1x128xf32>
      tpu.vector_store %arg6[%c0_28, %c0_29], %35 {strides = array<i32>} : memref<1x128xf32, #tpu.memory_space<vmem>>, vector<1x128xf32>,
      %c0_30 = arith.constant 0 : index
      %c0_31 = arith.constant 0 : index
      %37 = vector.load %arg4[%c0_30, %c0_31] : memref<1x128xf32, #tpu.memory_space<vmem>>, vector<1x128xf32>
      %38 = arith.mulf %23, %35 : vector<1x128xf32>
      %39 = arith.subf %37, %38 : vector<1x128xf32>
      %c0_32 = arith.constant 0 : index
      %c0_33 = arith.constant 0 : index
      %40 = vector.load %arg7[%c0_32, %c0_33] : memref<1x128xf32, #tpu.memory_space<vmem>>, vector<1x128xf32>
      tpu.vector_store %arg7[%c0_32, %c0_33], %39 {strides = array<i32>} : memref<1x128xf32, #tpu.memory_space<vmem>>, vector<1x128xf32>,
    } else {
    }
    return
  }
  func.func @transform_0(%arg0: i32) -> (i32, i32) {
    %c0_i32 = arith.constant 0 : i32
    %c0_i32_0 = arith.constant 0 : i32
    return %arg0, %c0_i32 : i32, i32
  }
  func.func @transform_1(%arg0: i32) -> (i32, i32) {
    %c0_i32 = arith.constant 0 : i32
    %c0_i32_0 = arith.constant 0 : i32
    %c0_i32_1 = arith.constant 0 : i32
    return %c0_i32, %c0_i32_0 : i32, i32
  }
  func.func @transform_2(%arg0: i32) -> (i32, i32) {
    %c0_i32 = arith.constant 0 : i32
    %c0_i32_0 = arith.constant 0 : i32
    %c0_i32_1 = arith.constant 0 : i32
    return %c0_i32, %c0_i32_0 : i32, i32
  }
  func.func @transform_3(%arg0: i32) -> (i32, i32) {
    %c0_i32 = arith.constant 0 : i32
    %c0_i32_0 = arith.constant 0 : i32
    %c0_i32_1 = arith.constant 0 : i32
    return %c0_i32, %c0_i32_0 : i32, i32
  }
  func.func @transform_4(%arg0: i32) -> (i32, i32) {
    %c0_i32 = arith.constant 0 : i32
    %c0_i32_0 = arith.constant 0 : i32
    return %arg0, %c0_i32 : i32, i32
  }
  func.func @transform_5(%arg0: i32) -> (i32, i32) {
    %c0_i32 = arith.constant 0 : i32
    %c0_i32_0 = arith.constant 0 : i32
    %c0_i32_1 = arith.constant 0 : i32
    return %c0_i32, %c0_i32_0 : i32, i32
  }
  func.func @transform_6(%arg0: i32) -> (i32, i32) {
    %c0_i32 = arith.constant 0 : i32
    %c0_i32_0 = arith.constant 0 : i32
    %c0_i32_1 = arith.constant 0 : i32
    return %c0_i32, %c0_i32_0 : i32, i32
  }
}

</mosaic_0001>

<bundles_post_ra>
// kernel: tpu_custom_call.1
= control target key start
LH: loop header
LB: loop body
LE: loop exit
PB: predicated region body
PF: predicated region fallthrough
CT: control target
= control target key end

     0   :  { %12 = vsyncpa [#allocation5], 0  ;;  %s547_s0 = inlined_call_operand.hbm [shape: f32[8,128], index: 0, kind: input, shape index: {}]   ;;  %s548_s1 = inlined_call_operand.hbm [shape: f32[128,128], index: 1, kind: input, shape index: {}]   ;;  %s549_s2 = inlined_call_operand.vmem [shape: f32[1,128], index: 2, kind: input, shape index: {}]   ;;  %s550_s3 = inlined_call_operand.vmem [shape: f32[1,128], index: 3, kind: input, shape index: {}]   ;;  %s551_s4 = inlined_call_operand.hbm [shape: f32[8,128], index: 4, kind: output, shape index: {0}]   ;;  %s552_s5 = inlined_call_operand.hbm [shape: f32[1,128], index: 5, kind: output, shape index: {1}]   ;;  %s553_s6 = inlined_call_operand.hbm [shape: f32[1,128], index: 6, kind: output, shape index: {2}]  }
   0x1   :  { %13 = vsyncpa [#allocation8], 0 }
   0x2   :  { %14 = vsyncpa [#allocation6], 0 }
   0x3   :  { %15 = vsyncpa [#allocation11], 0  ;;  %s429_s21 = smov [#allocation4]   ;;  %s430_s23 = smov [#allocation7]  }
   0x4   :  { %s22_s22 = sshll.u32 %s429_s21, 4  ;;  %s31_s24 = sshll.u32 %s430_s23, 4  ;;  %s23_s22 = int_to_ptr.vmem [resolvable:$true] %s22_s22  ;;  %s474_s24 = int_to_ptr.vmem [resolvable:$true] %s31_s24 }
   0x5   :  { %s311_s27 = scalar_lea.hbm %s547_s0, 128 }
   0x6   :  { %p312_p0 = scmp.ne.s32.totalorder %s547_s0, %s311_s27  ;;  %p315_p1 = scmp.lt.u32.totalorder %s311_s27, %s547_s0 }
   0x8   :  { %p317_p2 = pnand %p315_p1, %p312_p0 }
   0xa   :  { %320 = shalt.err (!%p317_p2)
}
   0xb   :  { %s321_s8 = scalar_lea.vmem %s23_s22, 128  ;;  %p326_p4 = scmp.lt.s32.totalorder %s23_s22, %s23_s22 }
   0xc   :  { %p322_p3 = scmp.ne.s32.totalorder %s23_s22, %s321_s8  ;;  %p327_p5 = scmp.lt.s32.totalorder %s321_s8, %s321_s8 }
   0xe   :  { %p328_p6 = por %p327_p5, %p326_p4 }
  0x10   :  { %p329_p7 = pnand %p328_p6, %p322_p3 }
  0x12   :  { %332 = shalt.err (!%p329_p7)
}
  0x13   :  { %25 = dma.hbm_to_vmem [thread:$0]  %s547_s0, 128, %s23_s22, [#allocation5]  }
  0x14   :  { %s333_s13 = scalar_lea.hbm %s548_s1, 2048 }
  0x15   :  { %p334_p8 = scmp.ne.s32.totalorder %s548_s1, %s333_s13  ;;  %p337_p9 = scmp.lt.u32.totalorder %s333_s13, %s548_s1 }
  0x17   :  { %p339_p10 = pnand %p337_p9, %p334_p8 }
  0x19   :  { %342 = shalt.err (!%p339_p10)
}
  0x1a   :  { %s343_s18 = scalar_lea.vmem %s474_s24, 2048  ;;  %p348_p12 = scmp.lt.s32.totalorder %s474_s24, %s474_s24 }
  0x1b   :  { %p344_p11 = scmp.ne.s32.totalorder %s474_s24, %s343_s18  ;;  %p349_p13 = scmp.lt.s32.totalorder %s343_s18, %s343_s18 }
  0x1d   :  { %p350_p0 = por %p349_p13, %p348_p12 }
  0x1f   :  { %p351_p1 = pnand %p350_p0, %p344_p11 }
  0x21   :  { %354 = shalt.err (!%p351_p1)
}
  0x22   :  { %s431_s0 = smov 128   ;;  %s432_s19 = smov 8  }
  0x23   :  { %37 = dma.hbm_to_vmem [thread:$0]  %s548_s1, 2048, %s474_s24, [#allocation8], %s431_s0, %s431_s0, %s432_s19  }
  0x24   :  { %421 = dma.done.wait [#allocation5], 128  }
  0x25   :  { %422 = vsyncadd [#allocation5], 4294967168 }
  0x26   :  { %423 = dma.done.wait [#allocation8], 2048  }
  0x27   :  { %424 = vsyncadd [#allocation8], 4294965248  ;;  %v433_v0 = vmov 0.0|0.0   ;;  %v434_v1 = vmov 0.0   ;;  %vm435_vm0 = vmmov 0   ;;  %v55_v2 = vld [vmem:[#allocation7] sm:$0xff] }
  0x28   :  { %275 = vmatprep.subr.bf16.mxu0 %v433_v0  ;;  %52 = vst [vmem:[#allocation2] sm:$0x1] %v434_v1  ;;  %53 = vst [vmem:[#allocation3] sm:$0x1] %v434_v1  ;;  %272 = vmatprep.mubr.msk.f32.mxu0 %vm435_vm0, %v434_v1  ;;  %v56_v3 = vld [vmem:[#allocation7 + $0x8] sm:$0xff]  ;;  %v57_v4 = vld [vmem:[#allocation7 + $0x10] sm:$0xff] }
  0x29   :  { %v276_v5 = vpack.c.bf16 %v56_v3, %v55_v2  ;;  %v58_v6 = vld [vmem:[#allocation7 + $0x18] sm:$0xff]  ;;  %v59_v8 = vld [vmem:[#allocation7 + $0x20] sm:$0xff]  ;;  %v60_v9 = vld [vmem:[#allocation7 + $0x28] sm:$0xff]  ;;  %s436_s1 = smov [#allocation9]  }
  0x2a   :  { %v279_v7 = vpack.c.bf16 %v58_v6, %v57_v4  ;;  %v282_v10 = vpack.c.bf16 %v60_v9, %v59_v8  ;;  %v61_v11 = vld [vmem:[#allocation7 + $0x30] sm:$0xff]  ;;  %v62_v12 = vld [vmem:[#allocation7 + $0x38] sm:$0xff]  ;;  %v63_v14 = vld [vmem:[#allocation7 + $0x40] sm:$0xff]  ;;  %s186_s22 = sshll.u32 %s436_s1, 4  ;;  %s187_s22 = int_to_ptr.vmem [resolvable:$true] %s186_s22 }
  0x2b   :  { %277 = vmatpush3.bf16.msra.mxu0 %v276_v5  ;;  %v285_v13 = vpack.c.bf16 %v62_v12, %v61_v11  ;;  %v64_v15 = vld [vmem:[#allocation7 + $0x48] sm:$0xff]  ;;  %v65_v17 = vld [vmem:[#allocation7 + $0x50] sm:$0xff]  ;;  %v66_v18 = vld [vmem:[#allocation7 + $0x58] sm:$0xff]  ;;  %s355_s23 = scalar_lea.vmem %s187_s22, 128  ;;  %p360_p3 = scmp.lt.s32.totalorder %s187_s22, %s187_s22 }
  0x2c   :  { %278 = vmatprep.subr.bf16.mxu0 %v433_v0  ;;  %v288_v16 = vpack.c.bf16 %v64_v15, %v63_v14  ;;  %v291_v19 = vpack.c.bf16 %v66_v18, %v65_v17  ;;  %v67_v20 = vld [vmem:[#allocation7 + $0x60] sm:$0xff]  ;;  %v68_v21 = vld [vmem:[#allocation7 + $0x68] sm:$0xff]  ;;  %v69_v23 = vld [vmem:[#allocation7 + $0x70] sm:$0xff]  ;;  %p356_p2 = scmp.ne.s32.totalorder %s187_s22, %s355_s23  ;;  %p361_p4 = scmp.lt.s32.totalorder %s355_s23, %s355_s23 }
  0x2d   :  { %v294_v22 = vpack.c.bf16 %v68_v21, %v67_v20  ;;  %v70_v24 = vld [vmem:[#allocation7 + $0x78] sm:$0xff] }
  0x2e   :  { %v297_v25 = vpack.c.bf16 %v70_v24, %v69_v23  ;;  %v54_v26 = vld [vmem:[#allocation4] sm:$0xff]  ;;  %p362_p5 = por %p361_p4, %p360_p3 }
  0x2f   :  { %280 = vmatpush3.bf16.msra.mxu0 %v279_v7 }
  0x30   :  { %281 = vmatprep.subr.bf16.mxu0 %v433_v0  ;;  %p363_p6 = pnand %p362_p5, %p356_p2 }
  0x33   :  { %283 = vmatpush3.bf16.msra.mxu0 %v282_v10 }
  0x34   :  { %284 = vmatprep.subr.bf16.mxu0 %v433_v0 }
  0x37   :  { %286 = vmatpush3.bf16.msra.mxu0 %v285_v13 }
  0x38   :  { %287 = vmatprep.subr.bf16.mxu0 %v433_v0 }
  0x3b   :  { %289 = vmatpush3.bf16.msra.mxu0 %v288_v16 }
  0x3c   :  { %290 = vmatprep.subr.bf16.mxu0 %v433_v0 }
  0x3f   :  { %292 = vmatpush3.bf16.msra.mxu0 %v291_v19 }
  0x40   :  { %293 = vmatprep.subr.bf16.mxu0 %v433_v0 }
  0x43   :  { %295 = vmatpush3.bf16.msra.mxu0 %v294_v22 }
  0x44   :  { %296 = vmatprep.subr.bf16.mxu0 %v433_v0 }
  0x47   :  { %298 = vmatpush3.bf16.msra.mxu0 %v297_v25 }
  0x4a   :  { %273 = vmatmul.mubr.f32.vlgmr.msra.gmra.mrb[0].mxu0 %v54_v26 }
 0x11d   :  { %v137_v27 = vpop.f32.mrb[0].mxu0 }
 0x11e   :  { %v143_v28 = vrot.slane %v137_v27, 4  ;;  %v152_v29 = vmul.f32 %v137_v27, %v137_v27  ;;  %141 = vst [vmem:[#allocation9] sm:$0xff] %v137_v27  ;;  %v274_v30 = vpop.f32.mrb[1].mxu0 }
 0x11f   :  { %366 = shalt.err (!%p363_p6)
}
 0x120   :  { %s367_s26 = scalar_lea.hbm %s551_s4, 128 }
 0x121   :  { %p368_p7 = scmp.ne.s32.totalorder %s551_s4, %s367_s26  ;;  %p371_p8 = scmp.lt.u32.totalorder %s367_s26, %s551_s4 }
 0x123   :  { %p373_p9 = pnand %p371_p8, %p368_p7 }
 0x125   :  { %376 = shalt.err (!%p373_p9)
}
 0x126   :  { %189 = dma.vmem_to_hbm [thread:$0]  %s187_s22, 128, %s551_s4, [#allocation6]   ;;  %v144_v31 = vadd.f32 %v143_v28, %v137_v27  ;;  %v153_v32 = vrot.slane %v152_v29, 4  ;;  %v142_v39 = vld [vmem:[#allocation2] sm:$0x1] }
 0x127   :  { %v151_v42 = vld [vmem:[#allocation3] sm:$0x1]  ;;  %v171_v54 = vld [vmem:[%s549_s2] sm:$0x1]  ;;  %s437_s10 = smov [#allocation10]   ;;  %s438_s14 = smov [#allocation12]  }
 0x128   :  { %v145_v33 = vrot.slane %v144_v31, 2  ;;  %v154_v34 = vadd.f32 %v153_v32, %v152_v29  ;;  %s196_s11 = sshll.u32 %s437_s10, 4  ;;  %v176_v57 = vld [vmem:[%s550_s3] sm:$0x1]  ;;  %s206_s15 = sshll.u32 %s438_s14, 4  ;;  %s197_s11 = int_to_ptr.vmem [resolvable:$true] %s196_s11  ;;  %s207_s15 = int_to_ptr.vmem [resolvable:$true] %s206_s15 }
 0x129   :  { %s377_s16 = scalar_lea.vmem %s197_s11, 16  ;;  %s381_s17 = scalar_lea.vmem %s197_s11, 32 }
 0x12a   :  { %v146_v35 = vadd.f32 %v145_v33, %v144_v31  ;;  %v155_v36 = vrot.slane %v154_v34, 2  ;;  %p378_p10 = scmp.ne.s32.totalorder %s197_s11, %s377_s16  ;;  %p382_p11 = scmp.lt.s32.totalorder %s197_s11, %s197_s11 }
 0x12b   :  { %p383_p12 = scmp.lt.s32.totalorder %s381_s17, %s377_s16 }
 0x12c   :  { %v147_v37 = vrot.slane %v146_v35, 1  ;;  %v156_v38 = vadd.f32 %v155_v36, %v154_v34 }
 0x12d   :  { %p384_p13 = por %p383_p12, %p382_p11 }
 0x12e   :  { %v148_v40 = vadd.f32 %v147_v37, %v146_v35  ;;  %v157_v41 = vrot.slane %v156_v38, 1 }
 0x12f   :  { %p385_p0 = pnand %p384_p13, %p378_p10 }
 0x130   :  { %v149_v43 = vadd.f32 %v148_v40, %v142_v39  ;;  %v158_v44 = vadd.f32 %v157_v41, %v156_v38 }
 0x132   :  { %150 = vst [vmem:[#allocation2] sm:$0x1] %v149_v43  ;;  %v159_v45 = vadd.f32 %v158_v44, %v151_v42 }
 0x134   :  { %160 = vst [vmem:[#allocation3] sm:$0x1] %v159_v45 }
 0x139   :  { %v164_v46 = vld [vmem:[#allocation2] sm:$0x1] }
 0x13a   :  { %v165_v47 = vmul.f32 0.125, %v164_v46 }
 0x13b   :  { %v166_v48 = vld [vmem:[#allocation3] sm:$0x1] }
 0x13c   :  { %v167_v49 = vmul.f32 0.125, %v166_v48  ;;  %v168_v50 = vmul.f32 %v165_v47, %v165_v47 }
 0x13e   :  { %v169_v51 = vsub.f32 %v167_v49, %v168_v50 }
 0x140   :  { %v170_v52 = vmax.f32 %v169_v51, 0.0 }
 0x142   :  { %v172_v53 = vadd.f32 1e-05, %v170_v52 }
 0x144   :  { %309 = vrsqrt.f32 %v172_v53 }
 0x14e   :  { %v310_v55 = vpop.eup %309 }
 0x14f   :  { %v174_v56 = vmul.f32 %v310_v55, %v171_v54 }
 0x151   :  { %175 = vst [vmem:[#allocation10] sm:$0x1] %v174_v56  ;;  %v177_v58 = vmul.f32 %v174_v56, %v165_v47 }
 0x152   :  { %388 = shalt.err (!%p385_p0)
}
 0x153   :  { %s389_s0 = scalar_lea.hbm %s552_s5, 16 }
 0x154   :  { %p390_p1 = scmp.ne.s32.totalorder %s552_s5, %s389_s0  ;;  %p393_p2 = scmp.lt.u32.totalorder %s389_s0, %s552_s5 }
 0x156   :  { %p395_p3 = pnand %p393_p2, %p390_p1 }
 0x158   :  { %398 = shalt.err (!%p395_p3)
}
 0x159   :  { %199 = dma.vmem_to_hbm [thread:$0]  %s197_s11, 16, %s552_s5, [#allocation11]   ;;  %v178_v59 = vsub.f32 %v176_v57, %v177_v58 }
 0x15a   :  { %s399_s23 = scalar_lea.vmem %s207_s15, 16  ;;  %s403_s24 = scalar_lea.vmem %s207_s15, 32 }
 0x15b   :  { %179 = vst [vmem:[#allocation12] sm:$0x1] %v178_v59  ;;  %p400_p4 = scmp.ne.s32.totalorder %s207_s15, %s399_s23  ;;  %p404_p5 = scmp.lt.s32.totalorder %s207_s15, %s207_s15 }
 0x15c   :  { %p405_p6 = scmp.lt.s32.totalorder %s403_s24, %s399_s23 }
 0x15e   :  { %p406_p7 = por %p405_p6, %p404_p5 }
 0x160   :  { %p407_p8 = pnand %p406_p7, %p400_p4 }
 0x162   :  { %410 = shalt.err (!%p407_p8)
}
 0x163   :  { %s411_s27 = scalar_lea.hbm %s553_s6, 16 }
 0x164   :  { %p412_p9 = scmp.ne.s32.totalorder %s553_s6, %s411_s27  ;;  %p415_p10 = scmp.lt.u32.totalorder %s411_s27, %s553_s6 }
 0x166   :  { %p417_p11 = pnand %p415_p10, %p412_p9 }
 0x168   :  { %420 = shalt.err (!%p417_p11)
}
 0x169   :  { %209 = dma.vmem_to_hbm [thread:$0]  %s207_s15, 16, %s553_s6, [#allocation11]  }
 0x16a   :  { %425 = dma.done.wait [#allocation6], 128  }
 0x16b   :  { %426 = vsyncadd [#allocation6], 4294967168 }
 0x16c   :  { %427 = dma.done.wait [#allocation11], 32  }
 0x16d   :  { %428 = vsyncadd [#allocation11], 4294967264 }
 0x16e   :  { %219 = vsyncpa [#allocation5], 1 }
 0x16f   :  { %220 = vsyncpa [#allocation8], 1 }
 0x170   :  { %221 = vsyncpa [#allocation6], 1 }
 0x171   :  { %222 = vsyncpa [#allocation11], 1 }

</bundles_post_ra>
